<compile_context>
chip_gen: v6e
topology: v6e:2x2x1
jax: 0.10.0
libtpu: 0.0.40
codegen_flags: <defaults>
</compile_context>

<pallas_src>
import functools
import math

import numpy as np
import jax
import jax.numpy as jnp
from jax.experimental import pallas as pl
from jax.experimental.pallas import tpu as pltpu

# ----------------------------- config (mirrors config.heads / config.weights) ---
HEAD_ORDER = ('heatmap', 'reg', 'widthHeight', 'dimension', 'amodal_offset',
              'velocity', 'depth', 'nuscenes_att')
HEAD_CHANNELS = {'heatmap': 4, 'reg': 2, 'widthHeight': 2, 'dimension': 3,
                 'amodal_offset': 2, 'velocity': 3, 'depth': 1, 'nuscenes_att': 8}
HEAD_WEIGHTS = {'heatmap': 1.0, 'reg': 1.0, 'widthHeight': 0.1, 'dimension': 1.0,
                'amodal_offset': 1.0, 'velocity': 1.0, 'depth': 1.0,
                'nuscenes_att': 1.0}
REG_HEADS = ('reg', 'widthHeight', 'dimension', 'amodal_offset', 'velocity')
_REG_DIMS = tuple(HEAD_CHANNELS[h] for h in REG_HEADS)              # (2, 2, 3, 2, 3)
_W = tuple(HEAD_WEIGHTS[h] for h in HEAD_ORDER)
# TODO(synk): 'rotation'/'rotation2' (BinRotLoss) are omitted from this head config;
# their torch.nonzero()-based dynamic row selection has no clean static Pallas mapping.

# channel layout of the lane-dense per-object slabs
_POS_COL = 0                      # gathered heatmap logit at the gt class
_DEP_COL = 1                      # depth logit / target / mask
_REG_COL0 = 2                     # 12 regression channels (REG_HEADS concatenated)
_ATT_COL0 = _REG_COL0 + sum(_REG_DIMS)   # 8 nuscenes_att channels
_N_COLS = _ATT_COL0 + HEAD_CHANNELS['nuscenes_att']                  # 22

_LOG_EPS = math.log(1e-4)
_LOG_1M_EPS = math.log(1.0 - 1e-4)


# ----------------------------- generation-aware sizing ---------------------------
def _tpu_vmem_budgets():
    """(input budget, vmem_limit_bytes cap) derived from physical VMEM."""
    try:
        cap = int(pltpu.get_tpu_info().vmem_capacity_bytes)
    except Exception:
        cap = 64 << 20                        # conservative (v7x-sized) fallback
    if cap <= (64 << 20):                     # v7x-class: 64 MiB per TensorCore
        return 20 << 20, 48 << 20
    return 56 << 20, 100 << 20                # v5e / v6e: 128 MiB


def _default_n_par():
    """2-way parallel split only on multi-TensorCore chips (v7x)."""
    try:
        kind = jax.devices()[0].device_kind.lower()
    except Exception:
        return 1
    return 2 if ('v7' in kind or '7x' in kind) else 1


# ----------------------------- kernel 1: focal-loss negative term ----------------
def _focal_neg_kernel(logit_ref, tgt_ref, out_ref, acc_ref, *, hw, n_seq):
    p = pl.program_id(0)
    s = pl.program_id(1)

    @pl.when(s == 0)
    def _():
        acc_ref[...] = jnp.zeros_like(acc_ref)

    rows, tile = acc_ref.shape
    # Ragged-tail / duplicated-block handling is done entirely in-kernel: lanes whose
    # global spatial index is >= H*W are forced to (x=0, t=1) so (1-t)^4 == 0 exactly
    # and no NaN/Inf from undefined padding data can reach the accumulator.
    start = (p * n_seq + s) * tile
    lane = jax.lax.broadcasted_iota(jnp.int32, (rows, tile), 1)
    valid = (start + lane) < hw

    x = jnp.where(valid, logit_ref[...].astype(jnp.float32), 0.0)
    t = jnp.where(valid, tgt_ref[...].astype(jnp.float32), 1.0)

    # clamped sigmoid: hm = clip(sigmoid(x), 1e-4, 1 - 1e-4), reusing e = exp(-|x|)
    e = jnp.exp(-jnp.abs(x))
    sig = jnp.where(x >= 0.0, 1.0, e) / (1.0 + e)
    hm = jnp.clip(sig, 1e-4, 1.0 - 1e-4)
    # log(1 - hm) == clip(-softplus(x), log(1e-4), log(1-1e-4)); stable (no log near
    # the clamp) and one cheap log1p on e <= 1.
    softplus = jnp.maximum(x, 0.0) + jnp.log1p(e)
    log_one_m_hm = jnp.clip(-softplus, _LOG_EPS, _LOG_1M_EPS)

    one_m_t = 1.0 - t
    omt2 = one_m_t * one_m_t
    acc_ref[...] += log_one_m_hm * (hm * hm) * (omt2 * omt2)   # VPU accumulate

    @pl.when(s == pl.num_programs(1) - 1)
    def _():
        out_ref[...] = jnp.full(out_ref.shape, jnp.sum(acc_ref[...]), jnp.float32)


def focal_neg_partials(hm_logits_2d, hm_target_2d, tile=None, n_par=None):
    """Per-parallel-block partial sums of the focal negative term.

    Inputs are (B*C, H*W) in their NATIVE dtype (bf16 logits welcome); the cast to
    f32 happens per tile inside the kernel.  Returns (n_par,) f32 whose sum is the
    full negative term.
    """
    rows, hw = hm_logits_2d.shape
    it = hm_logits_2d.dtype.itemsize + hm_target_2d.dtype.itemsize
    lane_blocks = pl.cdiv(hw, 128)

    budget, limit_cap = _tpu_vmem_budgets()
    if tile is None:
        # biggest lane tile keeping (2 double-buffered inputs + f32 accumulator)
        # inside the generation-aware budget; no artificial 4096-lane cap.
        per_lane = rows * (2 * it + 4)
        tile = (budget // per_lane) // 128 * 128
    tile = int(max(128, min((int(tile) // 128) * 128, lane_blocks * 128)))
    assert tile % 128 == 0

    n_tiles = int(pl.cdiv(hw, tile))
    if n_par is None:
        n_par = _default_n_par()
    n_par = max(1, min(int(n_par), n_tiles))
    n_seq = int(pl.cdiv(n_tiles, n_par))       # core split never silently collapses
    last_blk = n_tiles - 1

    # Clamp fully-out-of-range tiles onto the last real block; their contribution is
    # zeroed by the in-kernel validity mask (start >= hw for every lane).
    idx = lambda p, s: (0, jnp.minimum(p * n_seq + s, last_blk))

    need = rows * tile * (2 * it + 4) + 2 * n_par * 8 * 128 * 4
    vmem_limit = int(min(limit_cap, max(16 << 20, need + (2 << 20))))

    kernel = functools.partial(_focal_neg_kernel, hw=hw, n_seq=n_seq)
    partials = pl.pallas_call(
        kernel,
        out_shape=jax.ShapeDtypeStruct((n_par, 8, 128), jnp.float32),
        grid=(n_par, n_seq),
        in_specs=[pl.BlockSpec((rows, tile), idx),
                  pl.BlockSpec((rows, tile), idx)],
        out_specs=pl.BlockSpec((1, 8, 128), lambda p, s: (p, 0, 0)),
        scratch_shapes=[pltpu.VMEM((rows, tile), jnp.float32)],
        compiler_params=pltpu.CompilerParams(
            dimension_semantics=("parallel", "arbitrary"),
            vmem_limit_bytes=vmem_limit),
    )(hm_logits_2d, hm_target_2d)
    return partials[:, 0, 0]                          # (n_par,)


# ----------------------------- kernel 2: per-object losses + totals --------------
def _per_object_kernel(neg_ref, pred_ref, tgt_ref, mask_ref, out_ref):
    eps = 1e-4
    pred = pred_ref[...]
    tgt = tgt_ref[...]
    msk = mask_ref[...]
    n, nc = pred.shape
    col = jax.lax.broadcasted_iota(jnp.int32, (n, nc), 1)

    # Full-slab elementwise math (no width-1 lane slices), then one select and two
    # axis-0 (row) reductions instead of ~15 full-slab reductions.
    sig = 1.0 / (1.0 + jnp.exp(-pred))                # raw sigmoid (depth decode)
    sclip = jnp.clip(sig, 1e-4, 1.0 - 1e-4)           # clamped sigmoid (focal pos)
    one_m = 1.0 - sclip
    pos_c = jnp.log(sclip) * one_m * one_m * msk      # FastFocalLoss positive term
    dep_pred = 1.0 / (sig + 1e-6) - 1.0               # DepthLoss decode
    dep_c = jnp.abs(dep_pred * msk - tgt * msk)
    reg_c = jnp.abs(pred * msk - tgt * msk)           # RegWeightedL1Loss
    bce = jnp.maximum(pred, 0.0) - pred * tgt + jnp.log1p(jnp.exp(-jnp.abs(pred)))
    att_c = msk * bce                                 # WeightedBCELoss (with logits)

    contrib = jnp.where(col == _POS_COL, pos_c,
              jnp.where(col == _DEP_COL, dep_c,
              jnp.where(col < _ATT_COL0, reg_c, att_c)))

    col_sum = jnp.sum(contrib, axis=0, keepdims=True)   # (1, nc)
    msk_sum = jnp.sum(msk, axis=0, keepdims=True)        # (1, nc)

    # ---- FastFocalLoss finalize with the neg partials from kernel 1 ---------------
    num_pos = jnp.sum(msk_sum[:, _POS_COL:_POS_COL + 1])
    pos_loss = jnp.sum(col_sum[:, _POS_COL:_POS_COL + 1])
    neg_loss = jnp.float32(0.0)
    for i in range(neg_ref.shape[0]):                 # static, tiny
        neg_loss = neg_loss + neg_ref[i]
    hm_loss = jnp.where(num_pos == 0.0,
                        -neg_loss,
                        -(pos_loss + neg_loss) / jnp.maximum(num_pos, 1.0))

    # ---- DepthLoss -----------------------------------------------------------------
    dep_loss = jnp.sum(col_sum[:, _DEP_COL:_DEP_COL + 1]) \
        / (jnp.sum(msk_sum[:, _DEP_COL:_DEP_COL + 1]) + eps)

    # ---- RegWeightedL1Loss per regression head (static column groups) --------------
    reg_losses = []
    off = _REG_COL0
    for dim in _REG_DIMS:
        num = jnp.sum(col_sum[:, off:off + dim])
        den = jnp.sum(msk_sum[:, off:off + dim]) + eps
        reg_losses.append(num / den)
        off += dim

    # ---- WeightedBCELoss ------------------------------------------------------------
    att_loss = jnp.sum(col_sum[:, _ATT_COL0:]) / (jnp.sum(msk_sum[:, _ATT_COL0:]) + eps)

    # ---- weighted total (HEAD_ORDER) -------------------------------------------------
    losses = [hm_loss] + reg_losses + [dep_loss, att_loss]
    total = jnp.float32(0.0)
    for w, l in zip(_W, losses):
        total = total + w * l
    out_ref[0] = total
    for k, l in enumerate(losses):
        out_ref[k + 1] = l


def per_object_losses(neg_partials, pred_slab, tgt_slab, mask_slab):
    n_out = len(HEAD_ORDER) + 1
    smem = pl.BlockSpec(memory_space=pltpu.MemorySpace.SMEM)
    vmem = pl.BlockSpec(memory_space=pltpu.MemorySpace.VMEM)
    return pl.pallas_call(
        _per_object_kernel,
        out_shape=jax.ShapeDtypeStruct((n_out,), jnp.float32),
        in_specs=[smem, vmem, vmem, vmem],
        out_specs=smem,
    )(neg_partials, pred_slab, tgt_slab, mask_slab)


# ----------------------------- glue: GenericLoss.forward ------------------------
def _gather_feat(feat_nchw, ind):
    """torch _tranpose_and_gather_feat, but gathering on the native NCHW layout so no
    full-map NHWC copy is materialized; only the small (B, C, M) result is transposed."""
    b, c, h, w = feat_nchw.shape
    f = feat_nchw.reshape(b, c, h * w)
    idx = jnp.broadcast_to(ind[:, None, :], (b, c, ind.shape[1]))
    g = jnp.take_along_axis(f, idx, axis=2)                          # (B, C, M)
    return g.transpose(0, 2, 1)                                      # (B, M, C)


class GenericLossPallas:
    """Pallas implementation of GenericLoss.forward for the configured heads."""

    def __init__(self, heads=HEAD_CHANNELS, weights=HEAD_WEIGHTS,
                 tile=None, n_par=None):
        self.heads = heads
        self.weights = weights
        self.tile = tile          # None -> auto-sized against the VMEM budget
        self.n_par = n_par        # None -> 2 on v7x (2 TCs), 1 on v5e/v6e

    def __call__(self, outputs, batch):
        output = outputs[0]
        hm = output['heatmap']                                      # (B, C, H, W) logits
        B, C, H, W = hm.shape
        M = batch['indices'].shape[1]
        HW = H * W
        f32 = jnp.float32

        # hot path: full-map focal negative term; NATIVE dtype in (cast in-kernel),
        # no wrapper-side padding or upcast pass.  Pass bf16 network outputs directly.
        neg_partials = focal_neg_partials(hm.reshape(B * C, HW),
                                          batch['heatmap'].reshape(B * C, HW),
                                          tile=self.tile, n_par=self.n_par)

        # per-object gathers (data movement only)
        ind = batch['indices']
        pos_pix = _gather_feat(hm, ind)                             # (B, M, C) logits
        pos_logit = jnp.take_along_axis(pos_pix, batch['classIds'][:, :, None],
                                        axis=2)                     # (B, M, 1)
        dep_logit = _gather_feat(output['depth'], ind)              # (B, M, 1)
        reg_pred = jnp.concatenate([_gather_feat(output[h], ind) for h in REG_HEADS],
                                   axis=2)                          # (B, M, 12)
        reg_mask = jnp.concatenate([batch[h + '_mask'] for h in REG_HEADS], axis=2)
        reg_tgt = jnp.concatenate([batch[h] for h in REG_HEADS], axis=2)
        att_logit = _gather_feat(output['nuscenes_att'], ind)       # (B, M, 8)

        # three (N_pad, 22) slabs with a shared channel layout (row pad to 8 only)
        N = B * M
        pred_cols = jnp.concatenate(
            [pos_logit.reshape(N, 1), dep_logit.reshape(N, 1),
             reg_pred.reshape(N, -1), att_logit.reshape(N, 8)], axis=1).astype(f32)
        tgt_cols = jnp.concatenate(
            [jnp.zeros((N, 1), f32), batch['depth'].reshape(N, 1).astype(f32),
             reg_tgt.reshape(N, -1).astype(f32),
             batch['nuscenes_att'].reshape(N, 8).astype(f32)], axis=1)
        mask_cols = jnp.concatenate(
            [batch['mask'].reshape(N, 1).astype(f32),
             batch['depth_mask'].reshape(N, 1).astype(f32),
             reg_mask.reshape(N, -1).astype(f32),
             batch['nuscenes_att_mask'].reshape(N, 8).astype(f32)], axis=1)

        assert pred_cols.shape[1] == _N_COLS
        row_pad = (-N) % 8

        def pad_rows(x):  # zero padding -> padded rows contribute exactly 0
            return jnp.pad(x, ((0, row_pad), (0, 0))) if row_pad else x

        vec = per_object_losses(neg_partials,
                                pad_rows(pred_cols), pad_rows(tgt_cols),
                                pad_rows(mask_cols))
        losses = {h: vec[k + 1] for k, h in enumerate(HEAD_ORDER)}
        losses['total'] = vec[0]
        return vec[0], losses


# ----------------------------- pure-JAX reference (mirrors the torch code) ------
def reference_generic_loss(outputs, batch):
    out = outputs[0]
    sig = lambda x: 1.0 / (1.0 + jnp.exp(-x))
    hm = jnp.clip(sig(out['heatmap']), 1e-4, 1.0 - 1e-4)
    dep_map = 1.0 / (sig(out['depth']) + 1e-6) - 1.0

    ind = batch['indices']
    mask = batch['mask']
    cat = batch['classIds']
    t = batch['heatmap']

    losses = {}
    neg = jnp.sum(jnp.log(1.0 - hm) * hm ** 2 * (1.0 - t) ** 4)
    pos_pred = jnp.take_along_axis(_gather_feat(hm, ind), cat[:, :, None], axis=2)
    num_pos = jnp.sum(mask)
    pos = jnp.sum(jnp.log(pos_pred) * (1.0 - pos_pred) ** 2 * mask[:, :, None])
    losses['heatmap'] = jnp.where(num_pos == 0, -neg,
                                  -(pos + neg) / jnp.maximum(num_pos, 1.0))

    dep_pred = _gather_feat(dep_map, ind)
    dm = batch['depth_mask']
    losses['depth'] = jnp.sum(jnp.abs(dep_pred * dm - batch['depth'] * dm)) \
        / (jnp.sum(dm) + 1e-4)

    for h in REG_HEADS:
        p = _gather_feat(out[h], ind)
        m = batch[h + '_mask']
        losses[h] = jnp.sum(jnp.abs(p * m - batch[h] * m)) / (jnp.sum(m) + 1e-4)

    al = _gather_feat(out['nuscenes_att'], ind)
    am = batch['nuscenes_att_mask']
    at = batch['nuscenes_att']
    bce = jnp.maximum(al, 0.0) - al * at + jnp.log(1.0 + jnp.exp(-jnp.abs(al)))
    losses['nuscenes_att'] = jnp.sum(am * bce) / (jnp.sum(am) + 1e-4)

    total = 0.0
    for h in HEAD_ORDER:
        total = total + HEAD_WEIGHTS[h] * losses[h]
    losses['total'] = total
    return total, losses


# ----------------------------- main ---------------------------------------------
if __name__ == "__main__":
    # H*W = 400 is deliberately NOT a multiple of 128 -> exercises the in-kernel
    # ragged-tail mask; the (tile=128, n_par=3) config also exercises the clamped
    # (fully out-of-range) duplicated-block path of the parallel split.
    B, C, H, W, M = 2, HEAD_CHANNELS['heatmap'], 20, 20, 8
    keys = iter(jax.random.split(jax.random.PRNGKey(0), 32))
    nk = lambda: next(keys)

    # network outputs (logits / raw regressions), NCHW
    output = {
        'heatmap': jax.random.normal(nk(), (B, C, H, W), jnp.float32),
        'depth': jax.random.normal(nk(), (B, 1, H, W), jnp.float32),
        'nuscenes_att': jax.random.normal(nk(), (B, 8, H, W), jnp.float32),
    }
    for h in REG_HEADS:
        output[h] = jax.random.normal(nk(), (B, HEAD_CHANNELS[h], H, W), jnp.float32)

    # ground-truth batch
    batch = {
        'heatmap': jax.random.uniform(nk(), (B, C, H, W), jnp.float32),
        'indices': jax.random.randint(nk(), (B, M), 0, H * W, jnp.int32),
        'mask': jax.random.bernoulli(nk(), 0.7, (B, M)).astype(jnp.float32),
        'classIds': jax.random.randint(nk(), (B, M), 0, C, jnp.int32),
        'depth': jax.random.uniform(nk(), (B, M, 1), jnp.float32, 1.0, 60.0),
        'depth_mask': jax.random.bernoulli(nk(), 0.7, (B, M, 1)).astype(jnp.float32),
        'nuscenes_att': jax.random.bernoulli(nk(), 0.5, (B, M, 8)).astype(jnp.float32),
        'nuscenes_att_mask': jax.random.bernoulli(nk(), 0.7, (B, M, 8)).astype(jnp.float32),
    }
    for h in REG_HEADS:
        batch[h] = jax.random.normal(nk(), (B, M, HEAD_CHANNELS[h]), jnp.float32)
        batch[h + '_mask'] = jax.random.bernoulli(
            nk(), 0.7, (B, M, HEAD_CHANNELS[h])).astype(jnp.float32)

    ref_total, ref_losses = reference_generic_loss([output], batch)

    configs = [GenericLossPallas(),                     # auto tile, auto n_par
               GenericLossPallas(tile=128, n_par=2),    # multi-step accumulation
               GenericLossPallas(tile=128, n_par=3)]    # non-divisible -> clamped tiles
    for loss_fn in configs:
        total, losses = loss_fn([output], batch)
        total = jax.block_until_ready(total)
        np.testing.assert_allclose(np.asarray(total), np.asarray(ref_total),
                                   rtol=1e-3, atol=1e-3)
        for h in HEAD_ORDER:
            np.testing.assert_allclose(np.asarray(losses[h]),
                                       np.asarray(ref_losses[h]),
                                       rtol=1e-3, atol=1e-3)

    print("KERNEL_OK")
</pallas_src>

<mosaic_0001>
module attributes {stable_mosaic.version = 11 : i64} {
  func.func @_focal_neg_kernel(%arg0: i32, %arg1: i32, %arg2: memref<8x512xf32, #tpu.memory_space<vmem>>, %arg3: memref<8x512xf32, #tpu.memory_space<vmem>>, %arg4: memref<1x8x128xf32, #tpu.memory_space<vmem>>, %arg5: memref<8x512xf32, #tpu.memory_space<vmem>>) attributes {dimension_semantics = [#tpu.dimension_semantics<parallel>, #tpu.dimension_semantics<arbitrary>], iteration_bounds = array<i64: 1, 1>, scalar_prefetch = 0 : i64, scratch_operands = 1 : i64, tpu.core_type = #tpu.core_type<tc>, window_params = [{transform_indices = @transform_0, window_bounds = array<i64: 8, 512>}, {transform_indices = @transform_1, window_bounds = array<i64: 8, 512>}, {transform_indices = @transform_2, window_bounds = array<i64: 1, 8, 128>}]} {
    %c0_i32 = arith.constant 0 : i32
    %0 = arith.cmpi eq, %arg1, %c0_i32 : i32
    %1 = arith.extui %0 : i1 to i32
    %c0_i32_0 = arith.constant 0 : i32
    %2 = arith.cmpi ne, %1, %c0_i32_0 : i32
    scf.if %2 {
      %cst_22 = arith.constant 0.000000e+00 : f32
      %55 = vector.broadcast %cst_22 : f32 to vector<8x512xf32>
      %c0_23 = arith.constant 0 : index
      %c0_24 = arith.constant 0 : index
      %56 = vector.load %arg5[%c0_23, %c0_24] : memref<8x512xf32, #tpu.memory_space<vmem>>, vector<8x512xf32>
      tpu.vector_store %arg5[%c0_23, %c0_24], %55 {strides = array<i32>} : memref<8x512xf32, #tpu.memory_space<vmem>>, vector<8x512xf32>,
    } else {
    }
    %c1_i32 = arith.constant 1 : i32
    %3 = arith.muli %arg0, %c1_i32 : i32
    %4 = arith.addi %3, %arg1 : i32
    %c512_i32 = arith.constant 512 : i32
    %5 = arith.muli %4, %c512_i32 : i32
    %6 = tpu.iota {dimensions = array<i32: 1>} : vector<8x512xi32>
    %7 = vector.broadcast %5 : i32 to vector<8x512xi32>
    %8 = arith.addi %7, %6 : vector<8x512xi32>
    %c400_i32 = arith.constant 400 : i32
    %9 = vector.broadcast %c400_i32 : i32 to vector<8x512xi32>
    %10 = arith.cmpi slt, %8, %9 : vector<8x512xi32>
    %c0 = arith.constant 0 : index
    %c0_1 = arith.constant 0 : index
    %11 = vector.load %arg2[%c0, %c0_1] : memref<8x512xf32, #tpu.memory_space<vmem>>, vector<8x512xf32>
    %cst = arith.constant 0.000000e+00 : f32
    %12 = vector.broadcast %cst : f32 to vector<8x512xf32>
    %13 = arith.select %10, %11, %12 : vector<8x512xi1>, vector<8x512xf32>
    %c0_2 = arith.constant 0 : index
    %c0_3 = arith.constant 0 : index
    %14 = vector.load %arg3[%c0_2, %c0_3] : memref<8x512xf32, #tpu.memory_space<vmem>>, vector<8x512xf32>
    %cst_4 = arith.constant 1.000000e+00 : f32
    %15 = vector.broadcast %cst_4 : f32 to vector<8x512xf32>
    %16 = arith.select %10, %14, %15 : vector<8x512xi1>, vector<8x512xf32>
    %17 = math.absf %13 : vector<8x512xf32>
    %cst_5 = arith.constant 0.000000e+00 : f32
    %18 = vector.broadcast %cst_5 : f32 to vector<8x512xf32>
    %19 = arith.subf %18, %17 : vector<8x512xf32>
    %20 = math.exp %19 : vector<8x512xf32>
    %cst_6 = arith.constant 0.000000e+00 : f32
    %21 = vector.broadcast %cst_6 : f32 to vector<8x512xf32>
    %22 = arith.cmpf oge, %13, %21 : vector<8x512xf32>
    %cst_7 = arith.constant 1.000000e+00 : f32
    %23 = vector.broadcast %cst_7 : f32 to vector<8x512xf32>
    %24 = arith.select %22, %23, %20 : vector<8x512xi1>, vector<8x512xf32>
    %cst_8 = arith.constant 1.000000e+00 : f32
    %25 = vector.broadcast %cst_8 : f32 to vector<8x512xf32>
    %26 = arith.addf %25, %20 : vector<8x512xf32>
    %27 = arith.divf %24, %26 : vector<8x512xf32>
    %cst_9 = arith.constant 9.99999974E-5 : f32
    %cst_10 = arith.constant 0.999899983 : f32
    %28 = vector.broadcast %cst_9 : f32 to vector<8x512xf32>
    %29 = arith.maximumf %28, %27 : vector<8x512xf32>
    %30 = vector.broadcast %cst_10 : f32 to vector<8x512xf32>
    %31 = arith.minimumf %30, %29 : vector<8x512xf32>
    %cst_11 = arith.constant 0.000000e+00 : f32
    %32 = vector.broadcast %cst_11 : f32 to vector<8x512xf32>
    %33 = arith.maximumf %13, %32 : vector<8x512xf32>
    %34 = math.log1p %20 : vector<8x512xf32>
    %35 = arith.addf %33, %34 : vector<8x512xf32>
    %cst_12 = arith.constant 0.000000e+00 : f32
    %36 = vector.broadcast %cst_12 : f32 to vector<8x512xf32>
    %37 = arith.subf %36, %35 : vector<8x512xf32>
    %cst_13 = arith.constant -9.21034049 : f32
    %cst_14 = arith.constant -1.000050e-04 : f32
    %38 = vector.broadcast %cst_13 : f32 to vector<8x512xf32>
    %39 = arith.maximumf %38, %37 : vector<8x512xf32>
    %40 = vector.broadcast %cst_14 : f32 to vector<8x512xf32>
    %41 = arith.minimumf %40, %39 : vector<8x512xf32>
    %cst_15 = arith.constant 1.000000e+00 : f32
    %42 = vector.broadcast %cst_15 : f32 to vector<8x512xf32>
    %43 = arith.subf %42, %16 : vector<8x512xf32>
    %44 = arith.mulf %43, %43 : vector<8x512xf32>
    %c0_16 = arith.constant 0 : index
    %c0_17 = arith.constant 0 : index
    %45 = vector.load %arg5[%c0_16, %c0_17] : memref<8x512xf32, #tpu.memory_space<vmem>>, vector<8x512xf32>
    %46 = arith.mulf %31, %31 : vector<8x512xf32>
    %47 = arith.mulf %41, %46 : vector<8x512xf32>
    %48 = arith.mulf %44, %44 : vector<8x512xf32>
    %49 = arith.mulf %47, %48 : vector<8x512xf32>
    %50 = arith.addf %45, %49 : vector<8x512xf32>
    %c0_18 = arith.constant 0 : index
    %c0_19 = arith.constant 0 : index
    %51 = vector.load %arg5[%c0_18, %c0_19] : memref<8x512xf32, #tpu.memory_space<vmem>>, vector<8x512xf32>
    tpu.vector_store %arg5[%c0_18, %c0_19], %50 {strides = array<i32>} : memref<8x512xf32, #tpu.memory_space<vmem>>, vector<8x512xf32>,
    %c0_i32_20 = arith.constant 0 : i32
    %52 = arith.cmpi eq, %arg1, %c0_i32_20 : i32
    %53 = arith.extui %52 : i1 to i32
    %c0_i32_21 = arith.constant 0 : i32
    %54 = arith.cmpi ne, %53, %c0_i32_21 : i32
    scf.if %54 {
      %c0_22 = arith.constant 0 : index
      %c0_23 = arith.constant 0 : index
      %55 = vector.load %arg5[%c0_22, %c0_23] : memref<8x512xf32, #tpu.memory_space<vmem>>, vector<8x512xf32>
      %56 = vector.shape_cast %55 : vector<8x512xf32> to vector<1x8x512xf32>
      %cst_24 = arith.constant dense<0.000000e+00> : vector<1xf32>
      %57 = vector.multi_reduction <add>, %56, %cst_24 [1, 2] : vector<1x8x512xf32> to vector<1xf32>
      %58 = vector.shape_cast %57 : vector<1xf32> to vector<1x1x1xf32>
      %59 = vector.extract %58[0, 0, 0] : f32 from vector<1x1x1xf32>
      %60 = vector.broadcast %59 : f32 to vector<1x8x128xf32>
      %c0_25 = arith.constant 0 : index
      %c0_26 = arith.constant 0 : index
      %c0_27 = arith.constant 0 : index
      %61 = vector.load %arg4[%c0_25, %c0_26, %c0_27] : memref<1x8x128xf32, #tpu.memory_space<vmem>>, vector<1x8x128xf32>
      tpu.vector_store %arg4[%c0_25, %c0_26, %c0_27], %60 {strides = array<i32>} : memref<1x8x128xf32, #tpu.memory_space<vmem>>, vector<1x8x128xf32>,
    } else {
    }
    return
  }
  func.func @transform_0(%arg0: i32, %arg1: i32) -> (i32, i32) {
    %c1_i32 = arith.constant 1 : i32
    %0 = arith.muli %arg0, %c1_i32 : i32
    %1 = arith.addi %0, %arg1 : i32
    %c0_i32 = arith.constant 0 : i32
    %2 = arith.minsi %1, %c0_i32 : i32
    %c0_i32_0 = arith.constant 0 : i32
    %c0_i32_1 = arith.constant 0 : i32
    return %c0_i32_0, %2 : i32, i32
  }
  func.func @transform_1(%arg0: i32, %arg1: i32) -> (i32, i32) {
    %c1_i32 = arith.constant 1 : i32
    %0 = arith.muli %arg0, %c1_i32 : i32
    %1 = arith.addi %0, %arg1 : i32
    %c0_i32 = arith.constant 0 : i32
    %2 = arith.minsi %1, %c0_i32 : i32
    %c0_i32_0 = arith.constant 0 : i32
    %c0_i32_1 = arith.constant 0 : i32
    return %c0_i32_0, %2 : i32, i32
  }
  func.func @transform_2(%arg0: i32, %arg1: i32) -> (i32, i32, i32) {
    %c0_i32 = arith.constant 0 : i32
    %c0_i32_0 = arith.constant 0 : i32
    %c0_i32_1 = arith.constant 0 : i32
    return %arg0, %c0_i32, %c0_i32_0 : i32, i32, i32
  }
}

</mosaic_0001>

<bundles_post_ra>
// kernel: tpu_custom_call.1
= control target key start
LH: loop header
LB: loop body
LE: loop exit
PB: predicated region body
PF: predicated region fallthrough
CT: control target
= control target key end

     0   :  { %7 = vsyncpa [#allocation4], 0  ;;  %s470_s0 = inlined_call_operand.hbm [shape: f32[8,400], index: 0, kind: input, shape index: {}]   ;;  %s471_s1 = inlined_call_operand.hbm [shape: f32[8,400], index: 1, kind: input, shape index: {}]   ;;  %s472_s2 = inlined_call_operand.hbm [shape: f32[1,8,128], index: 2, kind: output, shape index: {}]  }
   0x1   :  { %8 = vsyncpa [#allocation7], 0 }
   0x2   :  { %9 = vsyncpa [#allocation5], 0  ;;  %s368_s9 = smov [#allocation3]   ;;  %s369_s11 = smov [#allocation6]  }
   0x3   :  { %s22_s10 = sshll.u32 %s368_s9, 4  ;;  %s38_s12 = sshll.u32 %s369_s11, 4  ;;  %s23_s10 = int_to_ptr.vmem [resolvable:$true] %s22_s10  ;;  %s39_s12 = int_to_ptr.vmem [resolvable:$true] %s38_s12 }
   0x4   :  { %s310_s13 = scalar_lea.vmem %s23_s10, 512  ;;  %p315_p1 = scmp.lt.s32.totalorder %s23_s10, %s23_s10 }
   0x5   :  { %p311_p0 = scmp.ne.s32.totalorder %s23_s10, %s310_s13  ;;  %p316_p2 = scmp.lt.s32.totalorder %s310_s13, %s310_s13 }
   0x7   :  { %p317_p3 = por %p316_p2, %p315_p1 }
   0x9   :  { %p318_p4 = pnand %p317_p3, %p311_p0 }
   0xb   :  { %321 = shalt.err (!%p318_p4)
}
   0xc   :  { %25 = dma.hbm_to_vmem [thread:$0]  %s470_s0, 512, %s23_s10, [#allocation4]  }
   0xd   :  { %s330_s16 = scalar_lea.vmem %s39_s12, 512  ;;  %p335_p6 = scmp.lt.s32.totalorder %s39_s12, %s39_s12 }
   0xe   :  { %p331_p5 = scmp.ne.s32.totalorder %s39_s12, %s330_s16  ;;  %p336_p7 = scmp.lt.s32.totalorder %s330_s16, %s330_s16 }
  0x10   :  { %p337_p8 = por %p336_p7, %p335_p6 }
  0x12   :  { %p338_p9 = pnand %p337_p8, %p331_p5 }
  0x14   :  { %341 = shalt.err (!%p338_p9)
}
  0x15   :  { %41 = dma.hbm_to_vmem [thread:$0]  %s471_s1, 512, %s39_s12, [#allocation7]  }
  0x16   :  { %362 = dma.done.wait [#allocation4], 512  }
  0x17   :  { %363 = vsyncadd [#allocation4], 4294966784 }
  0x18   :  { %364 = dma.done.wait [#allocation7], 512  }
  0x19   :  { %365 = vsyncadd [#allocation7], 4294966784  ;;  %v66_v0 = vlaneseq  ;;  %v392_v3 = vld [vmem:[#allocation3] sm:$0xff]  ;;  %v394_v4 = vld [vmem:[#allocation3 + $0x8] sm:$0xff]  ;;  %s370_s0 = smov [#allocation8]  }
  0x1a   :  { %v396_v5 = vld [vmem:[#allocation3 + $0x10] sm:$0xff]  ;;  %v83_v6 = vld [vmem:[#allocation3 + $0x18] sm:$0xff]  ;;  %v96_v7 = vand.u32 2147483647, %v392_v3  ;;  %v97_v9 = vand.u32 2147483647, %v394_v4 }
  0x1b   :  { %v67_v1 = vand.u32 127, %v66_v0  ;;  %v98_v10 = vand.u32 2147483647, %v396_v5  ;;  %v91_v28 = vld [vmem:[#allocation6 + $0x18] sm:$0xff]  ;;  %vm112_vm1 = vcmp.ge.f32.partialorder %v392_v3, 0.0  ;;  %v415_v30 = vld [vmem:[#allocation6] sm:$0xff] }
  0x1c   :  { %v100_v12 = vsub.f32 0.0, %v96_v7  ;;  %v101_v13 = vsub.f32 0.0, %v97_v9  ;;  %vm113_vm2 = vcmp.ge.f32.partialorder %v394_v4, 0.0  ;;  %v422_v33 = vld [vmem:[#allocation6 + $0x8] sm:$0xff]  ;;  %vm114_vm3 = vcmp.ge.f32.partialorder %v396_v5, 0.0  ;;  %v431_v40 = vld [vmem:[#allocation6 + $0x10] sm:$0xff] }
  0x1d   :  { %v70_v2 = vadd.s32 384, %v67_v1  ;;  %v102_v14 = vsub.f32 0.0, %v98_v10  ;;  %v140_v34 = vmax.f32 %v392_v3, 0.0  ;;  %v141_v37 = vmax.f32 %v394_v4, 0.0  ;;  %s259_s1 = sshll.u32 %s370_s0, 4  ;;  %s260_s1 = int_to_ptr.vmem [resolvable:$true] %s259_s1 }
  0x1e   :  { %v104_v16 = vmul.f32 1.442695, %v100_v12  ;;  %v106_v17 = vmul.f32 1.442695, %v101_v13  ;;  %v142_v38 = vmax.f32 %v396_v5, 0.0  ;;  %v196_v44 = vsub.f32 1.0, %v415_v30  ;;  %p347_p11 = scmp.lt.s32.totalorder %s260_s1, %s260_s1 }
  0x1f   :  { %vm79_vm0 = vcmp.lt.s32.totalorder %v70_v2, 400  ;;  %v108_v18 = vmul.f32 1.442695, %v102_v14  ;;  %v197_v49 = vsub.f32 1.0, %v422_v33  ;;  %v198_v59 = vsub.f32 1.0, %v431_v40  ;;  %s342_s20 = scalar_lea.vmem %s260_s1, 128 }
  0x20   :  { %v400_v8 = vsel %vm79_vm0, %v83_v6, 0.0  ;;  %278 = vpow2.f32 %v104_v16  ;;  %v418_v31 = vsel %vm79_vm0, %v91_v28, 1.0  ;;  %v200_v28 = vmul.f32 %v196_v44, %v196_v44  ;;  %p343_p10 = scmp.ne.s32.totalorder %s260_s1, %s342_s20  ;;  %p348_p12 = scmp.lt.s32.totalorder %s342_s20, %s342_s20 }
  0x21   :  { %v99_v11 = vand.u32 2147483647, %v400_v8  ;;  %280 = vpow2.f32 %v106_v17  ;;  %vm115_vm4 = vcmp.ge.f32.partialorder %v400_v8, 0.0  ;;  %v143_v42 = vmax.f32 %v400_v8, 0.0 }
  0x22   :  { %282 = vpow2.f32 %v108_v18  ;;  %v199_v0 = vsub.f32 1.0, %v418_v31  ;;  %v216_v44 = vmul.f32 %v200_v28, %v200_v28  ;;  %p349_p13 = por %p348_p12, %p347_p11 }
  0x23   :  { %v103_v15 = vsub.f32 0.0, %v99_v11 }
  0x24   :  { %p350_p0 = pnand %p349_p13, %p343_p10 }
  0x25   :  { %v110_v19 = vmul.f32 1.442695, %v103_v15 }
  0x27   :  { %284 = vpow2.f32 %v110_v19 }
  0x2d   :  { %v279_v20 = vpop.eup %278 }
  0x2e   :  { %v405_v21 = vpop.eup %280  ;;  %v120_v22 = vadd.f32 1.0, %v279_v20  ;;  %v147_v29 = vmul.f32 -0.5, %v279_v20  ;;  %v116_v36 = vsel %vm112_vm1, 1.0, %v279_v20  ;;  %v150_v47 = vand.u32 2147483647, %v279_v20 }
  0x2f   :  { %v407_v23 = vpop.eup %282  ;;  %v121_v24 = vadd.f32 1.0, %v405_v21  ;;  %v156_v32 = vmul.f32 -0.5, %v405_v21  ;;  %v117_v41 = vsel %vm113_vm2, 1.0, %v405_v21  ;;  %v159_v53 = vand.u32 2147483647, %v405_v21 }
  0x30   :  { %v122_v26 = vadd.f32 1.0, %v407_v23  ;;  %286 = vrcp.f32 %v120_v22  ;;  %v165_v35 = vmul.f32 -0.5, %v407_v23  ;;  %v148_v43 = vadd.f32 1.0, %v147_v29 }
  0x31   :  { %288 = vrcp.f32 %v121_v24  ;;  %v118_v46 = vsel %vm114_vm3, 1.0, %v407_v23  ;;  %v157_v48 = vadd.f32 1.0, %v156_v32  ;;  %v168_v57 = vand.u32 2147483647, %v407_v23 }
  0x32   :  { %290 = vrcp.f32 %v122_v26  ;;  %v166_v54 = vadd.f32 1.0, %v165_v35  ;;  %v149_v62 = vmul.f32 %v279_v20, %v148_v43  ;;  %vm446_vm5 = vcmp.lt.f32.partialorder %v150_v47, 0.0004427343 }
  0x33   :  { %v158_v5 = vmul.f32 %v405_v21, %v157_v48  ;;  %vm451_vm6 = vcmp.lt.f32.partialorder %v159_v53, 0.0004427343  ;;  %vm456_vm7 = vcmp.lt.f32.partialorder %v168_v57, 0.0004427343 }
  0x34   :  { %v410_v25 = vpop.eup %284  ;;  %v167_v10 = vmul.f32 %v407_v23, %v166_v54 }
  0x35   :  { %v123_v27 = vadd.f32 1.0, %v410_v25  ;;  %v174_v39 = vmul.f32 -0.5, %v410_v25  ;;  %v119_v51 = vsel %vm115_vm4, 1.0, %v410_v25  ;;  %v177_v63 = vand.u32 2147483647, %v410_v25 }
  0x37   :  { %292 = vrcp.f32 %v123_v27  ;;  %v175_v58 = vadd.f32 1.0, %v174_v39  ;;  %vm178_vm8 = vcmp.lt.f32.partialorder %v177_v63, 0.0004427343 }
  0x38   :  { %294 = vlog2.f32 %v120_v22 }
  0x39   :  { %296 = vlog2.f32 %v121_v24  ;;  %v176_v15 = vmul.f32 %v410_v25, %v175_v58 }
  0x3a   :  { %298 = vlog2.f32 %v122_v26 }
  0x3b   :  { %300 = vlog2.f32 %v123_v27 }
  0x3d   :  { %v287_v45 = vpop.eup %286 }
  0x3e   :  { %v289_v50 = vpop.eup %288  ;;  %v125_v52 = vmul.f32 %v287_v45, %v116_v36  ;;  %v201_v36 = vmul.f32 %v197_v49, %v197_v49 }
  0x3f   :  { %v291_v55 = vpop.eup %290  ;;  %v127_v56 = vmul.f32 %v289_v50, %v117_v41  ;;  %v202_v41 = vmul.f32 %v198_v59, %v198_v59 }
  0x40   :  { %v129_v61 = vmul.f32 %v291_v55, %v118_v46  ;;  %v132_v3 = vmax.f32 %v125_v52, 0.0001  ;;  %v203_v46 = vmul.f32 %v199_v0, %v199_v0  ;;  %v217_v53 = vmul.f32 %v201_v36, %v201_v36 }
  0x41   :  { %v133_v7 = vmax.f32 %v127_v56, 0.0001  ;;  %v218_v55 = vmul.f32 %v202_v41, %v202_v41 }
  0x42   :  { %v134_v12 = vmax.f32 %v129_v61, 0.0001  ;;  %v136_v20 = vmin.f32 %v132_v3, 0.9999  ;;  %v219_v57 = vmul.f32 %v203_v46, %v203_v46 }
  0x43   :  { %v137_v24 = vmin.f32 %v133_v7, 0.9999 }
  0x44   :  { %v293_v60 = vpop.eup %292  ;;  %v138_v25 = vmin.f32 %v134_v12, 0.9999  ;;  %v208_v43 = vmul.f32 %v136_v20, %v136_v20 }
  0x45   :  { %v295_v1 = vpop.eup %294  ;;  %v131_v2 = vmul.f32 %v293_v60, %v119_v51  ;;  %v209_v47 = vmul.f32 %v137_v24, %v137_v24 }
  0x46   :  { %v297_v6 = vpop.eup %296  ;;  %v146_v8 = vmul.f32 0.6931472, %v295_v1 }
  0x47   :  { %v299_v11 = vpop.eup %298  ;;  %v155_v13 = vmul.f32 0.6931472, %v297_v6  ;;  %v135_v17 = vmax.f32 %v131_v2, 0.0001 }
  0x48   :  { %v301_v16 = vpop.eup %300  ;;  %v152_v18 = vsel %vm446_vm5, %v149_v62, %v146_v8  ;;  %v164_v19 = vmul.f32 0.6931472, %v299_v11 }
  0x49   :  { %v161_v21 = vsel %vm451_vm6, %v158_v5, %v155_v13  ;;  %v173_v22 = vmul.f32 0.6931472, %v301_v16  ;;  %v180_v23 = vadd.f32 %v152_v18, %v140_v34  ;;  %v139_v32 = vmin.f32 %v135_v17, 0.9999 }
  0x4a   :  { %v170_v26 = vsel %vm456_vm7, %v167_v10, %v164_v19  ;;  %v181_v27 = vadd.f32 %v161_v21, %v141_v37  ;;  %v210_v37 = vmul.f32 %v138_v25, %v138_v25 }
  0x4b   :  { %v179_v29 = vsel %vm178_vm8, %v176_v15, %v173_v22  ;;  %v182_v30 = vadd.f32 %v170_v26, %v142_v38  ;;  %v184_v31 = vsub.f32 0.0, %v180_v23  ;;  %v211_v38 = vmul.f32 %v139_v32, %v139_v32 }
  0x4c   :  { %v183_v33 = vadd.f32 %v179_v29, %v143_v42  ;;  %v185_v35 = vsub.f32 0.0, %v181_v27 }
  0x4d   :  { %v186_v39 = vsub.f32 0.0, %v182_v30  ;;  %v188_v40 = vmax.f32 %v184_v31, -9.2103405 }
  0x4e   :  { %v187_v45 = vsub.f32 0.0, %v183_v33  ;;  %v189_v34 = vmax.f32 %v185_v35, -9.2103405 }
  0x4f   :  { %v190_v48 = vmax.f32 %v186_v39, -9.2103405  ;;  %v192_v50 = vmin.f32 %v188_v40, -0.000100005 }
  0x50   :  { %v191_v51 = vmax.f32 %v187_v45, -9.2103405  ;;  %v193_v52 = vmin.f32 %v189_v34, -0.000100005 }
  0x51   :  { %v194_v54 = vmin.f32 %v190_v48, -0.000100005  ;;  %v212_v42 = vmul.f32 %v208_v43, %v192_v50 }
  0x52   :  { %v195_v49 = vmin.f32 %v191_v51, -0.000100005  ;;  %v213_v56 = vmul.f32 %v209_v47, %v193_v52 }
  0x53   :  { %v214_v58 = vmul.f32 %v210_v37, %v194_v54  ;;  %v220_v59 = vmul.f32 %v216_v44, %v212_v42 }
  0x54   :  { %v215_v60 = vmul.f32 %v211_v38, %v195_v49  ;;  %v221_v61 = vmul.f32 %v217_v53, %v213_v56 }
  0x55   :  { %v222_v62 = vmul.f32 %v218_v55, %v214_v58 }
  0x56   :  { %v223_v63 = vmul.f32 %v219_v57, %v215_v60  ;;  %v239_v0 = vadd.f32 %v221_v61, %v220_v59 }
  0x58   :  { %v240_v1 = vadd.f32 %v239_v0, %v222_v62 }
  0x5a   :  { %v241_v2 = vadd.f32 %v240_v1, %v223_v63 }
  0x5c   :  { %242 = vadd.xlane.f32.xlu0 %v241_v2 }
  0xe5   :  { %v243_v3 = vpop.xlane.xlu0 %242 }
  0xe6   :  { %v244_v4 = vrot.slane %v243_v3, 4 }
  0xe8   :  { %v245_v5 = vadd.f32 %v244_v4, %v243_v3 }
  0xea   :  { %v246_v6 = vrot.slane %v245_v5, 2 }
  0xec   :  { %v247_v7 = vadd.f32 %v246_v6, %v245_v5 }
  0xee   :  { %v248_v8 = vrot.slane %v247_v7, 1 }
  0xf0   :  { %v249_v9 = vadd.f32 %v248_v8, %v247_v7 }
  0xf2   :  { %273 = vpush %v249_v9 }
 0x123   :  { %s274_s19 = spop %273 }
 0x124   :  { %v251_v10 = vstv %s274_s19 }
 0x125   :  { %252 = vst [vmem:[#allocation8] sm:$0xff] %v251_v10 }
 0x126   :  { %353 = shalt.err (!%p350_p0)
}
 0x127   :  { %262 = dma.vmem_to_hbm [thread:$0]  %s260_s1, 128, %s472_s2, [#allocation5]  }
 0x128   :  { %366 = dma.done.wait [#allocation5], 128  }
 0x129   :  { %367 = vsyncadd [#allocation5], 4294967168 }
 0x12a   :  { %266 = vsyncpa [#allocation4], 1 }
 0x12b   :  { %267 = vsyncpa [#allocation7], 1 }
 0x12c   :  { %268 = vsyncpa [#allocation5], 1 }

</bundles_post_ra>
